<compile_context>
chip_gen: v7x
topology: tpu7x:2x2x1
jax: 0.10.0
libtpu: 0.0.40
codegen_flags: <defaults>
</compile_context>

<pallas_src>
import functools

import jax
import jax.numpy as jnp
from jax.experimental import pallas as pl
from jax.experimental.pallas import tpu as pltpu

LN_EPS = 1e-5


def _round_up(x, m):
    return (x + m - 1) // m * m


def _linear_layer_kernel(x_ref, gamma_ref, beta_ref, w_ref, b_ref, o_ref,
                         *, layer_norm: bool, relu: bool):
    # x_ref: (TR, D_in) row tile; gamma/beta: (1, D_in); w_ref: (D_in, TN);
    # b_ref: (1, TN); o_ref: (TR, TN)
    x = x_ref[...]

    if layer_norm:
        xf = x.astype(jnp.float32)
        mean = jnp.mean(xf, axis=-1, keepdims=True)
        centered = xf - mean
        var = jnp.mean(centered * centered, axis=-1, keepdims=True)
        xn = centered * jax.lax.rsqrt(var + LN_EPS)
        xn = xn * gamma_ref[...].astype(jnp.float32) + beta_ref[...].astype(jnp.float32)
        # Feed the MXU in the native input dtype (bf16 stays bf16 -> native MXU path).
        x = xn.astype(x_ref.dtype)

    # Dropout (p=0.1) is identity at inference time.

    y = jnp.dot(x, w_ref[...], preferred_element_type=jnp.float32)
    y = y + b_ref[...].astype(jnp.float32)

    if relu:
        y = jnp.maximum(y, 0.0)

    o_ref[...] = y.astype(o_ref.dtype)


def linear_layer_forward(x, gamma, beta, w, b, *, layer_norm=True, relu=True,
                         row_tile=256, out_tile=256):
    """x: (N, L, D_in) -> (N, L, D_out).  w: (D_in, D_out), b: (D_out,)."""
    N, L, D_in = x.shape
    D_in_w, D_out = w.shape
    assert D_in_w == D_in

    rows = N * L
    sub = 16 if x.dtype == jnp.bfloat16 else 8  # sublane packing granularity

    # Row tile: big for real workloads, auto-shrunk (but sublane-aligned) for
    # small ones.  Rows are zero-padded up to a multiple of the tile.
    rt = max(sub, min(_round_up(row_tile, sub), _round_up(rows, sub)))
    rows_p = _round_up(rows, rt)

    # D_out tile: lane-dense (multiple of 128); D_out is zero-padded up to a
    # multiple of the tile so stores are unmasked.
    tn = max(128, min(_round_up(out_tile, 128), _round_up(D_out, 128)))
    d_out_p = _round_up(D_out, tn)

    x2 = x.reshape(rows, D_in)
    if rows_p != rows:
        x2 = jnp.pad(x2, ((0, rows_p - rows), (0, 0)))
    gamma2 = gamma.reshape(1, D_in)
    beta2 = beta.reshape(1, D_in)
    w_p = w if d_out_p == D_out else jnp.pad(w, ((0, 0), (0, d_out_p - D_out)))
    b_p = b if d_out_p == D_out else jnp.pad(b, (0, d_out_p - D_out))
    b2 = b_p.reshape(1, d_out_p)

    grid = (rows_p // rt, d_out_p // tn)

    kernel = functools.partial(_linear_layer_kernel,
                               layer_norm=layer_norm, relu=relu)

    # VMEM budget: double-buffered x / out / weight tiles + resident
    # gamma/beta/bias + f32 temporaries (LN intermediate, f32 accumulator).
    xb = jnp.dtype(x.dtype).itemsize
    wb = jnp.dtype(w.dtype).itemsize
    est = (2 * rt * D_in * xb          # x tiles (double-buffered)
           + 2 * rt * tn * xb          # out tiles
           + 2 * D_in * tn * wb        # weight tiles
           + 2 * D_in * 4 + tn * 4     # gamma/beta/bias
           + rt * D_in * 4             # f32 LN temporary
           + rt * tn * 4)              # f32 matmul accumulator
    vmem_limit = int(min(max(2 * est, 32 * 1024 * 1024), 48 * 1024 * 1024))

    out2 = pl.pallas_call(
        kernel,
        out_shape=jax.ShapeDtypeStruct((rows_p, d_out_p), x.dtype),
        grid_spec=pltpu.PrefetchScalarGridSpec(
            num_scalar_prefetch=0,
            grid=grid,
            in_specs=[
                pl.BlockSpec((rt, D_in), lambda i, j: (i, 0)),   # x row tile
                pl.BlockSpec((1, D_in), lambda i, j: (0, 0)),    # gamma
                pl.BlockSpec((1, D_in), lambda i, j: (0, 0)),    # beta
                pl.BlockSpec((D_in, tn), lambda i, j: (0, j)),   # weight column tile
                pl.BlockSpec((1, tn), lambda i, j: (0, j)),      # bias tile
            ],
            out_specs=pl.BlockSpec((rt, tn), lambda i, j: (i, j)),
        ),
        compiler_params=pltpu.CompilerParams(
            dimension_semantics=("parallel", "parallel"),
            vmem_limit_bytes=vmem_limit),
    )(x2, gamma2, beta2, w_p, b2)

    return out2[:rows, :D_out].reshape(N, L, D_out)


def _reference(x, gamma, beta, w, b, *, layer_norm=True, relu=True):
    xf = x.astype(jnp.float32)
    if layer_norm:
        mean = jnp.mean(xf, axis=-1, keepdims=True)
        var = jnp.mean((xf - mean) ** 2, axis=-1, keepdims=True)
        xf = (xf - mean) / jnp.sqrt(var + LN_EPS) * gamma + beta
    y = jnp.einsum("nld,do->nlo", xf, w.astype(jnp.float32)) + b
    if relu:
        y = jnp.maximum(y, 0.0)
    return y.astype(x.dtype)


if __name__ == "__main__":
    key = jax.random.PRNGKey(0)
    kx, kw, kb, kx2, kw2, kb2 = jax.random.split(key, 6)

    # --- Test 1: small shapes consistent with the module's (N, L, D) layout ---
    N, L, D_in, D_out = 2, 8, 32, 64
    x = jax.random.normal(kx, (N, L, D_in), dtype=jnp.float32)
    gamma = jnp.ones((D_in,), dtype=jnp.float32)          # LayerNorm weight
    beta = jnp.zeros((D_in,), dtype=jnp.float32)          # LayerNorm bias
    # nn.Linear weight is (out, in); store pre-transposed as (in, out).
    w = (jax.random.normal(kw, (D_in, D_out), dtype=jnp.float32)
         * (1.0 / jnp.sqrt(D_in)))
    b = jax.random.normal(kb, (D_out,), dtype=jnp.float32) * 0.01

    out = linear_layer_forward(x, gamma, beta, w, b, layer_norm=True, relu=True)
    jax.block_until_ready(out)
    ref = _reference(x, gamma, beta, w, b, layer_norm=True, relu=True)
    assert out.shape == (N, L, D_out)
    assert jnp.allclose(out, ref, atol=1e-4, rtol=1e-4)

    # --- Test 2: odd shapes exercising row / D_out padding paths ---
    N2, L2, D_in2, D_out2 = 2, 7, 32, 48
    x2 = jax.random.normal(kx2, (N2, L2, D_in2), dtype=jnp.float32)
    gamma2 = jnp.ones((D_in2,), dtype=jnp.float32) * 1.1
    beta2 = jnp.full((D_in2,), 0.05, dtype=jnp.float32)
    w2 = (jax.random.normal(kw2, (D_in2, D_out2), dtype=jnp.float32)
          * (1.0 / jnp.sqrt(D_in2)))
    b2 = jax.random.normal(kb2, (D_out2,), dtype=jnp.float32) * 0.01

    out2 = linear_layer_forward(x2, gamma2, beta2, w2, b2,
                                layer_norm=True, relu=True)
    jax.block_until_ready(out2)
    ref2 = _reference(x2, gamma2, beta2, w2, b2, layer_norm=True, relu=True)
    assert out2.shape == (N2, L2, D_out2)
    assert jnp.allclose(out2, ref2, atol=1e-4, rtol=1e-4)

    print("KERNEL_OK")
</pallas_src>

<mosaic_0001>
module attributes {stable_mosaic.version = 11 : i64} {
  func.func @_linear_layer_kernel(%arg0: i32, %arg1: i32, %arg2: memref<16x32xf32, #tpu.memory_space<vmem>>, %arg3: memref<1x32xf32, #tpu.memory_space<vmem>>, %arg4: memref<1x32xf32, #tpu.memory_space<vmem>>, %arg5: memref<32x128xf32, #tpu.memory_space<vmem>>, %arg6: memref<1x128xf32, #tpu.memory_space<vmem>>, %arg7: memref<16x128xf32, #tpu.memory_space<vmem>>) attributes {dimension_semantics = [#tpu.dimension_semantics<parallel>, #tpu.dimension_semantics<parallel>], iteration_bounds = array<i64: 1, 1>, scalar_prefetch = 0 : i64, scratch_operands = 0 : i64, tpu.core_type = #tpu.core_type<tc>, window_params = [{transform_indices = @transform_0, window_bounds = array<i64: 16, 32>}, {pipeline_mode = #tpu.pipeline_mode<synchronous>, transform_indices = @transform_1, window_bounds = array<i64: 1, 32>}, {pipeline_mode = #tpu.pipeline_mode<synchronous>, transform_indices = @transform_2, window_bounds = array<i64: 1, 32>}, {transform_indices = @transform_3, window_bounds = array<i64: 32, 128>}, {transform_indices = @transform_4, window_bounds = array<i64: 1, 128>}, {transform_indices = @transform_5, window_bounds = array<i64: 16, 128>}]} {
    %c0 = arith.constant 0 : index
    %c0_0 = arith.constant 0 : index
    %0 = vector.load %arg2[%c0, %c0_0] : memref<16x32xf32, #tpu.memory_space<vmem>>, vector<16x32xf32>
    %cst = arith.constant dense<0.000000e+00> : vector<16xf32>
    %1 = vector.multi_reduction <add>, %0, %cst [1] : vector<16x32xf32> to vector<16xf32>
    %2 = vector.shape_cast %1 : vector<16xf32> to vector<16x1xf32>
    %cst_1 = arith.constant 3.200000e+01 : f32
    %3 = vector.broadcast %cst_1 : f32 to vector<16x1xf32>
    %4 = arith.divf %2, %3 : vector<16x1xf32>
    %5 = vector.broadcast %4 : vector<16x1xf32> to vector<16x32xf32>
    %6 = arith.subf %0, %5 : vector<16x32xf32>
    %7 = arith.mulf %6, %6 : vector<16x32xf32>
    %cst_2 = arith.constant dense<0.000000e+00> : vector<16xf32>
    %8 = vector.multi_reduction <add>, %7, %cst_2 [1] : vector<16x32xf32> to vector<16xf32>
    %9 = vector.shape_cast %8 : vector<16xf32> to vector<16x1xf32>
    %cst_3 = arith.constant 3.200000e+01 : f32
    %10 = vector.broadcast %cst_3 : f32 to vector<16x1xf32>
    %11 = arith.divf %9, %10 : vector<16x1xf32>
    %cst_4 = arith.constant 9.99999974E-6 : f32
    %12 = vector.broadcast %cst_4 : f32 to vector<16x1xf32>
    %13 = arith.addf %11, %12 : vector<16x1xf32>
    %14 = math.rsqrt %13 : vector<16x1xf32>
    %15 = vector.broadcast %14 : vector<16x1xf32> to vector<16x32xf32>
    %16 = arith.mulf %6, %15 : vector<16x32xf32>
    %c0_5 = arith.constant 0 : index
    %c0_6 = arith.constant 0 : index
    %17 = vector.load %arg3[%c0_5, %c0_6] : memref<1x32xf32, #tpu.memory_space<vmem>>, vector<1x32xf32>
    %18 = vector.broadcast %17 : vector<1x32xf32> to vector<16x32xf32>
    %19 = arith.mulf %16, %18 : vector<16x32xf32>
    %c0_7 = arith.constant 0 : index
    %c0_8 = arith.constant 0 : index
    %20 = vector.load %arg4[%c0_7, %c0_8] : memref<1x32xf32, #tpu.memory_space<vmem>>, vector<1x32xf32>
    %21 = vector.broadcast %20 : vector<1x32xf32> to vector<16x32xf32>
    %22 = arith.addf %19, %21 : vector<16x32xf32>
    %c0_9 = arith.constant 0 : index
    %c0_10 = arith.constant 0 : index
    %23 = vector.load %arg5[%c0_9, %c0_10] : memref<32x128xf32, #tpu.memory_space<vmem>>, vector<32x128xf32>
    %cst_11 = arith.constant dense<0.000000e+00> : vector<16x128xf32>
    %24 = tpu.matmul %22, %23, %cst_11 {dimension_numbers = #tpu.dot_dimension_numbers<[1], [0], [0], [1], [0, 0, 1, 1], [], []>} : vector<16x32xf32>, vector<32x128xf32>, vector<16x128xf32> -> vector<16x128xf32>
    %c0_12 = arith.constant 0 : index
    %c0_13 = arith.constant 0 : index
    %25 = vector.load %arg6[%c0_12, %c0_13] : memref<1x128xf32, #tpu.memory_space<vmem>>, vector<1x128xf32>
    %26 = vector.broadcast %25 : vector<1x128xf32> to vector<16x128xf32>
    %27 = arith.addf %24, %26 : vector<16x128xf32>
    %cst_14 = arith.constant 0.000000e+00 : f32
    %28 = vector.broadcast %cst_14 : f32 to vector<16x128xf32>
    %29 = arith.maximumf %27, %28 : vector<16x128xf32>
    %c0_15 = arith.constant 0 : index
    %c0_16 = arith.constant 0 : index
    %30 = vector.load %arg7[%c0_15, %c0_16] : memref<16x128xf32, #tpu.memory_space<vmem>>, vector<16x128xf32>
    tpu.vector_store %arg7[%c0_15, %c0_16], %29 {strides = array<i32>} : memref<16x128xf32, #tpu.memory_space<vmem>>, vector<16x128xf32>,
    return
  }
  func.func @transform_0(%arg0: i32, %arg1: i32) -> (i32, i32) {
    %c0_i32 = arith.constant 0 : i32
    %c0_i32_0 = arith.constant 0 : i32
    return %arg0, %c0_i32 : i32, i32
  }
  func.func @transform_1(%arg0: i32, %arg1: i32) -> (i32, i32) {
    %c0_i32 = arith.constant 0 : i32
    %c0_i32_0 = arith.constant 0 : i32
    %c0_i32_1 = arith.constant 0 : i32
    return %c0_i32, %c0_i32_0 : i32, i32
  }
  func.func @transform_2(%arg0: i32, %arg1: i32) -> (i32, i32) {
    %c0_i32 = arith.constant 0 : i32
    %c0_i32_0 = arith.constant 0 : i32
    %c0_i32_1 = arith.constant 0 : i32
    return %c0_i32, %c0_i32_0 : i32, i32
  }
  func.func @transform_3(%arg0: i32, %arg1: i32) -> (i32, i32) {
    %c0_i32 = arith.constant 0 : i32
    %c0_i32_0 = arith.constant 0 : i32
    return %c0_i32, %arg1 : i32, i32
  }
  func.func @transform_4(%arg0: i32, %arg1: i32) -> (i32, i32) {
    %c0_i32 = arith.constant 0 : i32
    %c0_i32_0 = arith.constant 0 : i32
    return %c0_i32, %arg1 : i32, i32
  }
  func.func @transform_5(%arg0: i32, %arg1: i32) -> (i32, i32) {
    %c0_i32 = arith.constant 0 : i32
    return %arg0, %arg1 : i32, i32
  }
}

</mosaic_0001>

<bundles_post_ra>
// kernel: tpu_custom_call.1
= control target key start
LH: loop header
LB: loop body
LE: loop exit
PB: predicated region body
PF: predicated region fallthrough
CT: control target
= control target key end

     0   :  { %10 = vsyncpa [#allocation3], 0  ;;  %s417_s0 = inlined_call_operand.hbm [shape: f32[16,32], index: 0, kind: input, shape index: {}]   ;;  %s418_s1 = inlined_call_operand.vmem [shape: f32[1,32], index: 1, kind: input, shape index: {}]   ;;  %s419_s2 = inlined_call_operand.vmem [shape: f32[1,32], index: 2, kind: input, shape index: {}]   ;;  %s420_s3 = inlined_call_operand.hbm [shape: f32[32,128], index: 3, kind: input, shape index: {}]   ;;  %s421_s4 = inlined_call_operand.vmem [shape: f32[1,128], index: 4, kind: input, shape index: {}]   ;;  %s422_s5 = inlined_call_operand.hbm [shape: f32[16,128], index: 5, kind: output, shape index: {}]  }
   0x1   :  { %11 = vsyncpa [#allocation6], 0 }
   0x2   :  { %12 = vsyncpa [#allocation4], 0  ;;  %s322_s18 = smov [#allocation2]   ;;  %s250_s22 = scalar_lea.hbm %s417_s0, 256 }
   0x3   :  { %s18_s19 = sshll.u32 %s322_s18, 4  ;;  %p251_p0 = scmp.ne.s32.totalorder %s417_s0, %s250_s22  ;;  %s19_s19 = int_to_ptr.vmem [resolvable:$true] %s18_s19 }
   0x4   :  { %p254_p1 = scmp.lt.u32.totalorder %s250_s22, %s417_s0 }
   0x6   :  { %p256_p2 = pnand %p254_p1, %p251_p0 }
   0x8   :  { %259 = shalt.err (!%p256_p2)
}
   0x9   :  { %s260_s27 = scalar_lea.vmem %s19_s19, 256  ;;  %p265_p4 = scmp.lt.s32.totalorder %s19_s19, %s19_s19 }
   0xa   :  { %p261_p3 = scmp.ne.s32.totalorder %s19_s19, %s260_s27  ;;  %p266_p5 = scmp.lt.s32.totalorder %s260_s27, %s260_s27 }
   0xc   :  { %p267_p6 = por %p266_p5, %p265_p4 }
   0xe   :  { %p268_p7 = pnand %p267_p6, %p261_p3 }
  0x10   :  { %271 = shalt.err (!%p268_p7)
}
  0x11   :  { %s323_s28 = smov 128   ;;  %s324_s29 = smov 8  }
  0x12   :  { %24 = dma.hbm_to_vmem [thread:$0]  %s417_s0, 256, %s19_s19, [#allocation3], %s323_s28, %s323_s28, %s324_s29  }
  0x13   :  { %s325_s7 = smov [#allocation5]   ;;  %s272_s11 = scalar_lea.hbm %s420_s3, 512 }
  0x14   :  { %s34_s8 = sshll.u32 %s325_s7, 4  ;;  %p273_p8 = scmp.ne.s32.totalorder %s420_s3, %s272_s11  ;;  %s35_s8 = int_to_ptr.vmem [resolvable:$true] %s34_s8 }
  0x15   :  { %p276_p9 = scmp.lt.u32.totalorder %s272_s11, %s420_s3 }
  0x17   :  { %p278_p10 = pnand %p276_p9, %p273_p8 }
  0x19   :  { %281 = shalt.err (!%p278_p10)
}
  0x1a   :  { %s282_s16 = scalar_lea.vmem %s35_s8, 512  ;;  %p287_p12 = scmp.lt.s32.totalorder %s35_s8, %s35_s8 }
  0x1b   :  { %p283_p11 = scmp.ne.s32.totalorder %s35_s8, %s282_s16  ;;  %p288_p13 = scmp.lt.s32.totalorder %s282_s16, %s282_s16 }
  0x1d   :  { %p289_p0 = por %p288_p13, %p287_p12 }
  0x1f   :  { %p290_p1 = pnand %p289_p0, %p283_p11 }
  0x21   :  { %293 = shalt.err (!%p290_p1)
}
  0x22   :  { %40 = dma.hbm_to_vmem [thread:$0]  %s420_s3, 512, %s35_s8, [#allocation6], %s323_s28, %s323_s28, %s324_s29  }
  0x23   :  { %316 = dma.done.wait [#allocation3], 256  }
  0x24   :  { %317 = vsyncadd [#allocation3], 4294967040 }
  0x25   :  { %318 = dma.done.wait [#allocation6], 512  }
  0x26   :  { %319 = vsyncadd [#allocation6], 4294966784  ;;  %vm51_vm0 = vcmask 261120   ;;  %v49_v0 = vld [vmem:[#allocation2] sm:$0xff]  ;;  %v50_v1 = vld [vmem:[#allocation2 + $0x8] sm:$0xff] }
  0x27   :  { %v52_v2 = vsel %vm51_vm0, %v49_v0, 0.0  ;;  %v55_v3 = vsel %vm51_vm0, %v50_v1, 0.0  ;;  %v97_v14 = vld [vmem:[#allocation5] sm:$0xff]  ;;  %v98_v15 = vld [vmem:[#allocation5 + $0x8] sm:$0xff]  ;;  %v99_v16 = vld [vmem:[#allocation5 + $0x10] sm:$0xff] }
  0x28   :  { %53 = vadd.xlane.f32.xlu0 %v52_v2  ;;  %v233_v17 = vpack.c.bf16 %v98_v15, %v97_v14  ;;  %v100_v18 = vld [vmem:[#allocation5 + $0x18] sm:$0xff]  ;;  %v211_v27 = vld [vmem:[%s418_s1] ss:$0 sm:$0xff]  ;;  %s326_s1 = smov [#allocation7]  }
  0x29   :  { %v237_v19 = vpack.c.bf16 %v100_v18, %v99_v16  ;;  %v212_v29 = vld [vmem:[%s419_s2] ss:$0 sm:$0xff]  ;;  %s198_s23 = sshll.u32 %s326_s1, 4  ;;  %s199_s23 = int_to_ptr.vmem [resolvable:$true] %s198_s23 }
  0x2a   :  { %234 = vmatprep.subr.bf16.mxu0 %v233_v17  ;;  %v213_v36 = vld [vmem:[%s421_s4] ss:$0 sm:$0xff]  ;;  %s294_s2 = scalar_lea.vmem %s199_s23, 256  ;;  %p299_p3 = scmp.lt.s32.totalorder %s199_s23, %s199_s23 }
  0x2b   :  { %236 = vmatpush3.bf16.msra.mxu0 %v233_v17  ;;  %p295_p2 = scmp.ne.s32.totalorder %s199_s23, %s294_s2  ;;  %p300_p4 = scmp.lt.s32.totalorder %s294_s2, %s294_s2 }
  0x2c   :  { %56 = vadd.xlane.f32.xlu0 %v55_v3  ;;  %238 = vmatprep.subr.bf16.mxu0 %v237_v19 }
  0x2d   :  { %p301_p5 = por %p300_p4, %p299_p3 }
  0x2f   :  { %240 = vmatpush3.bf16.msra.mxu0 %v237_v19  ;;  %p302_p6 = pnand %p301_p5, %p295_p2 }
  0xb5   :  { %v54_v4 = vpop.xlane.xlu0 %53 }
  0xb6   :  { %v59_v5 = vmul.f32 0.03125, %v54_v4 }
  0xb8   :  { %v61_v6 = vsub.f32 %v49_v0, %v59_v5 }
  0xb9   :  { %v57_v7 = vpop.xlane.xlu0 %56 }
  0xba   :  { %v60_v8 = vmul.f32 0.03125, %v57_v7  ;;  %v63_v9 = vmul.f32 %v61_v6, %v61_v6 }
  0xbc   :  { %v62_v10 = vsub.f32 %v50_v1, %v60_v8  ;;  %v65_v11 = vsel %vm51_vm0, %v63_v9, 0.0 }
  0xbd   :  { %66 = vadd.xlane.f32.xlu1 %v65_v11 }
  0xbe   :  { %v64_v12 = vmul.f32 %v62_v10, %v62_v10 }
  0xc0   :  { %v68_v13 = vsel %vm51_vm0, %v64_v12, 0.0 }
  0xc1   :  { %69 = vadd.xlane.f32.xlu1 %v68_v13 }
 0x14a   :  { %v67_v20 = vpop.xlane.xlu1 %66 }
 0x14b   :  { %v71_v21 = vmul.f32 0.03125, %v67_v20 }
 0x14d   :  { %v73_v22 = vadd.f32 1e-05, %v71_v21 }
 0x14e   :  { %v70_v23 = vpop.xlane.xlu1 %69 }
 0x14f   :  { %246 = vrsqrt.f32 %v73_v22  ;;  %v72_v24 = vmul.f32 0.03125, %v70_v23 }
 0x151   :  { %v74_v25 = vadd.f32 1e-05, %v72_v24 }
 0x153   :  { %248 = vrsqrt.f32 %v74_v25 }
 0x159   :  { %v247_v26 = vpop.eup %246 }
 0x15a   :  { %v77_v28 = vmul.f32 %v247_v26, %v61_v6 }
 0x15c   :  { %v86_v30 = vmul.f32 %v211_v27, %v77_v28 }
 0x15d   :  { %v249_v31 = vpop.eup %248 }
 0x15e   :  { %v78_v32 = vmul.f32 %v249_v31, %v62_v10  ;;  %v95_v33 = vadd.f32 %v212_v29, %v86_v30 }
 0x160   :  { %v87_v34 = vmul.f32 %v211_v27, %v78_v32  ;;  %230 = vmatprep.mubr.msk.f32.mxu0 %vm51_vm0, %v95_v33 }
 0x162   :  { %v96_v35 = vadd.f32 %v212_v29, %v87_v34 }
 0x164   :  { %231 = vmatmul.mubr.msk.f32.vlgmr.msra.gmra.mrb[0].mxu0 %vm51_vm0, %v96_v35 }
 0x237   :  { %v232_v37 = vpop.f32.mrb[0].mxu0 }
 0x238   :  { %v186_v38 = vadd.f32 %v232_v37, %v213_v36  ;;  %v180_v39 = vpop.f32.mrb[1].mxu0 }
 0x239   :  { %v181_v40 = vadd.f32 %v213_v36, %v180_v39 }
 0x23a   :  { %v190_v41 = vmax.f32 %v186_v38, 0.0 }
 0x23b   :  { %v189_v42 = vmax.f32 %v181_v40, 0.0 }
 0x23c   :  { %192 = vst [vmem:[#allocation7 + $0x8] sm:$0xff] %v190_v41 }
 0x23d   :  { %191 = vst [vmem:[#allocation7] sm:$0xff] %v189_v42 }
 0x23e   :  { %305 = shalt.err (!%p302_p6)
}
 0x23f   :  { %s306_s25 = scalar_lea.hbm %s422_s5, 256 }
 0x240   :  { %p307_p7 = scmp.ne.s32.totalorder %s422_s5, %s306_s25  ;;  %p310_p8 = scmp.lt.u32.totalorder %s306_s25, %s422_s5 }
 0x242   :  { %p312_p9 = pnand %p310_p8, %p307_p7 }
 0x244   :  { %315 = shalt.err (!%p312_p9)
}
 0x245   :  { %204 = dma.vmem_to_hbm [thread:$0]  %s199_s23, 256, %s422_s5, [#allocation4], %s323_s28, %s323_s28, %s324_s29  }
 0x246   :  { %320 = dma.done.wait [#allocation4], 256  }
 0x247   :  { %321 = vsyncadd [#allocation4], 4294967040 }
 0x248   :  { %208 = vsyncpa [#allocation3], 1 }
 0x249   :  { %209 = vsyncpa [#allocation6], 1 }
 0x24a   :  { %210 = vsyncpa [#allocation4], 1 }

</bundles_post_ra>
